<compile_context>
chip_gen: v7x
topology: tpu7x:2x2x1
jax: 0.10.0
libtpu: 0.0.40
codegen_flags: <defaults>
</compile_context>

<pallas_src>
import functools
import math

import jax
import jax.numpy as jnp
import numpy as np
from jax.experimental import pallas as pl
from jax.experimental.pallas import tpu as pltpu


def _cdiv(a, b):
    return (a + b - 1) // b


def _round_up(v, m):
    return _cdiv(v, m) * m


def _layernorm_fm(x, w, b, eps=1e-6):
    # Feature-major LayerNorm: reduce over the feature (sublane) axis 0.
    # Spec uses partial(nn.LayerNorm, eps=1e-06) -> eps = 1e-6.
    mu = jnp.mean(x, axis=0, keepdims=True)
    xc = x - mu
    var = jnp.mean(xc * xc, axis=0, keepdims=True)
    return xc * jax.lax.rsqrt(var + eps) * w + b


def _gelu_tanh(x):
    # tanh-form GELU (EUP tanh, otherwise idle); max deviation from exact
    # erf-GELU ~3e-4, well inside the validation tolerance.
    c = 0.7978845608028654  # sqrt(2/pi)
    return 0.5 * x * (1.0 + jnp.tanh(c * (x + 0.044715 * x * x * x)))


def _sub_roll(x, shift):
    # Static roll along the feature (sublane) axis.  shift is a multiple of
    # KF=8, so this is an aligned vreg-row permutation (same effect/cost as
    # pltpu.roll(x, shift=shift, axis=0)); it is the in-kernel channel roll
    # that replaces the C-times-replicated shifted weight blocks.
    if shift == 0:
        return x
    return jnp.concatenate([x[-shift:], x[:-shift]], axis=0)


def _encoder_kernel(x_ref, ln1w_ref, ln1b_ref, wqkv_ref, bqkv_ref, wfc_ref,
                    bfc_ref, ln2w_ref, ln2b_ref, w1_ref, b1_ref, w2_ref,
                    b2_ref, out_ref, *, C, KF):
    H = C * KF
    x = x_ref[...]                                   # (H, TB) f32, feature-major

    # ---- LayerNorm 1 ----
    x1 = _layernorm_fm(x, ln1w_ref[...], ln1b_ref[...])

    # ---- QKV: one block-diagonal (3H, H) @ (H, TB) matmul, bf16 in / f32 acc ----
    qkv = jnp.dot(wqkv_ref[...], x1.astype(jnp.bfloat16),
                  preferred_element_type=jnp.float32) + bqkv_ref[...]
    q = qkv[0:H] * (1.0 / math.sqrt(KF))
    k = qkv[H:2 * H]
    v = qkv[2 * H:3 * H]

    # ---- criss-cross attention, full lane width ----
    # With k rolled down by s channel blocks, q * k_roll holds
    # score[l, m=(l-s)%C] for every query channel l at once; the softmax over
    # the key channel m is then an elementwise max/exp/sum over the C rolled
    # copies (no 8-lane slices, no lane relayouts).
    scores = [q * _sub_roll(k, s * KF) for s in range(C)]
    mx = scores[0]
    for t in scores[1:]:
        mx = jnp.maximum(mx, t)
    exps = [jnp.exp(t - mx) for t in scores]
    den = exps[0]
    for t in exps[1:]:
        den = den + t
    vinv = v * pl.reciprocal(den, approx=True)       # EUP reciprocal (free slot)
    # context[m] = sum_l attn[l, m] * v_l : roll each term back to its key channel
    ctx = exps[0] * vinv
    for s in range(1, C):
        ctx = ctx + _sub_roll(exps[s] * vinv, H - s * KF)

    # ---- shared fc_out as a block-diagonal (H, H) matmul ----
    attn_out = jnp.dot(wfc_ref[...], ctx.astype(jnp.bfloat16),
                       preferred_element_type=jnp.float32) + bfc_ref[...]

    x2 = attn_out + x                                # residual (dropout = identity)

    # ---- LayerNorm 2 + MLP (Linear -> GELU -> Linear) ----
    y = _layernorm_fm(x2, ln2w_ref[...], ln2b_ref[...])
    h = jnp.dot(w1_ref[...], y.astype(jnp.bfloat16),
                preferred_element_type=jnp.float32) + b1_ref[...]
    g = _gelu_tanh(h)
    y2 = jnp.dot(w2_ref[...], g.astype(jnp.bfloat16),
                 preferred_element_type=jnp.float32) + b2_ref[...]

    out_ref[...] = x2 + y2


def _prep_weights(p, C, KF, mlp_dim):
    """Feature-major weights.  Only block-diagonal structure is materialised
    (no shifted per-roll copies): wqkvT is (3H, H), wfcT is (H, H)."""
    H = C * KF
    f32 = np.float32
    wq = np.asarray(p["wq"], f32)
    wk = np.asarray(p["wk"], f32)
    wv = np.asarray(p["wv"], f32)
    bq = np.asarray(p["bq"], f32)
    bk = np.asarray(p["bk"], f32)
    bv = np.asarray(p["bv"], f32)

    wqkvT = np.zeros((3 * H, H), f32)
    bqkv = np.zeros((3 * H,), f32)
    for c in range(C):
        cols = slice(c * KF, (c + 1) * KF)
        for part, (w_, b_) in enumerate(((wq, bq), (wk, bk), (wv, bv))):
            rows = slice(part * H + c * KF, part * H + (c + 1) * KF)
            wqkvT[rows, cols] = w_[c].T
            bqkv[rows] = b_[c]

    wfc = np.asarray(p["wfc"], f32)
    wfcT = np.zeros((H, H), f32)
    for m in range(C):
        blk = slice(m * KF, (m + 1) * KF)
        wfcT[blk, blk] = wfc.T
    bfc = np.tile(np.asarray(p["bfc"], f32), C)

    def col(v):
        return jnp.asarray(np.asarray(v, f32).reshape(-1, 1))

    return (jnp.asarray(wqkvT, jnp.bfloat16), col(bqkv),
            jnp.asarray(wfcT, jnp.bfloat16), col(bfc),
            jnp.asarray(np.asarray(p["w1"], f32).T, jnp.bfloat16), col(p["b1"]),
            jnp.asarray(np.asarray(p["w2"], f32).T, jnp.bfloat16), col(p["b2"]),
            col(p["ln1w"]), col(p["ln1b"]), col(p["ln2w"]), col(p["ln2b"]))


def encoder_block_pallas(x, p, *, in_channels, k_factor, mlp_dim, row_tile=2048):
    N, L, H = x.shape
    C, KF = in_channels, k_factor
    assert H == C * KF

    (wqkvT, bqkv, wfcT, bfc, w1T, b1, w2T, b2,
     ln1w, ln1b, ln2w, ln2b) = _prep_weights(p, C, KF, mlp_dim)

    # Every (n, l) row is independent -> flatten to R rows and put them on the
    # 128-lane axis (feature-major).  TB is a multiple of 128; cap it so the
    # "parallel" grid keeps >= 2 steps on large inputs (v7x: 2 TensorCores).
    R = N * L
    half = _round_up(_cdiv(R, 2), 128)
    TB = max(128, min(_round_up(row_tile, 128), half))
    grid = _cdiv(R, TB)
    R_pad = grid * TB

    # Layout plumbing: the transpose presents lane-dense (H, TB) blocks; the
    # <= TB-1 rows of tail padding ride the same copy (no separate full
    # pad/slice pass over the activations).  Padded columns are per-column
    # garbage-free (zeros) and are sliced off below.
    xT = jnp.pad(x.reshape(R, H).astype(jnp.float32),
                 ((0, R_pad - R), (0, 0))).T                      # (H, R_pad)

    def full_spec(a):
        return pl.BlockSpec(a.shape, lambda i: (0, 0))

    in_specs = [
        pl.BlockSpec((H, TB), lambda i: (0, i)),     # activation tile (feature-major)
        full_spec(ln1w), full_spec(ln1b),
        full_spec(wqkvT), full_spec(bqkv),
        full_spec(wfcT), full_spec(bfc),
        full_spec(ln2w), full_spec(ln2b),
        full_spec(w1T), full_spec(b1),
        full_spec(w2T), full_spec(b2),
    ]
    out_specs = pl.BlockSpec((H, TB), lambda i: (0, i))

    kernel = functools.partial(_encoder_kernel, C=C, KF=KF)
    outT = pl.pallas_call(
        kernel,
        out_shape=jax.ShapeDtypeStruct((H, R_pad), jnp.float32),
        grid=(grid,),
        in_specs=in_specs,
        out_specs=out_specs,
        compiler_params=pltpu.CompilerParams(
            dimension_semantics=("parallel",),
            # ~<16 MiB live at TB=2048 incl. double buffers: fits the 32 MiB
            # default scoped VMEM on every generation (incl. v7x's 64 MiB chip).
            # v5e/v6e can push row_tile to 4096-8192 with a higher limit.
            vmem_limit_bytes=32 * 1024 * 1024),
    )(xT, ln1w, ln1b, wqkvT, bqkv, wfcT, bfc, ln2w, ln2b, w1T, b1, w2T, b2)

    return outT[:, :R].T.reshape(N, L, H)


def init_params(key, in_channels, k_factor, hidden, mlp_dim):
    ks = jax.random.split(key, 16)
    n = lambda k, shape, s: (s * jax.random.normal(k, shape)).astype(jnp.float32)
    skf, sh, sm = 1.0 / math.sqrt(k_factor), 1.0 / math.sqrt(hidden), 1.0 / math.sqrt(mlp_dim)
    return dict(
        ln1w=1.0 + n(ks[0], (hidden,), 0.1), ln1b=n(ks[1], (hidden,), 0.1),
        # per-channel qkv Linear(k_factor, 3*k_factor), stored transposed & split q/k/v
        wq=n(ks[2], (in_channels, k_factor, k_factor), skf), bq=n(ks[3], (in_channels, k_factor), 0.1),
        wk=n(ks[4], (in_channels, k_factor, k_factor), skf), bk=n(ks[5], (in_channels, k_factor), 0.1),
        wv=n(ks[6], (in_channels, k_factor, k_factor), skf), bv=n(ks[7], (in_channels, k_factor), 0.1),
        # shared fc_out Linear(k_factor, k_factor), stored transposed
        wfc=n(ks[8], (k_factor, k_factor), skf), bfc=n(ks[9], (k_factor,), 0.1),
        ln2w=1.0 + n(ks[10], (hidden,), 0.1), ln2b=n(ks[11], (hidden,), 0.1),
        # MLPBlock: Linear(hidden, mlp_dim) -> GELU -> Linear(mlp_dim, hidden), stored transposed
        w1=n(ks[12], (hidden, mlp_dim), sh), b1=n(ks[13], (mlp_dim,), 1e-3),
        w2=n(ks[14], (mlp_dim, hidden), sm), b2=n(ks[15], (hidden,), 1e-3),
    )


def encoder_block_ref(x, p, *, in_channels, k_factor, mlp_dim):
    # Pure-JAX reference written to mirror the PyTorch ops literally (f32).
    C, KF = in_channels, k_factor
    hp = functools.partial(jnp.matmul, precision=jax.lax.Precision.HIGHEST)

    def ln(z, w, b):
        mu = z.mean(-1, keepdims=True)
        var = ((z - mu) ** 2).mean(-1, keepdims=True)
        return (z - mu) / jnp.sqrt(var + 1e-6) * w + b

    x1 = ln(x, p["ln1w"], p["ln1b"])
    qs, ks_, vs = [], [], []
    for c in range(C):
        ch = x1[..., c * KF:(c + 1) * KF]
        qs.append(hp(ch, p["wq"][c]) + p["bq"][c])
        ks_.append(hp(ch, p["wk"][c]) + p["bk"][c])
        vs.append(hp(ch, p["wv"][c]) + p["bv"][c])
    queries = jnp.stack(qs, -1)[..., None]          # (N,L,KF,C,1)
    keys = jnp.stack(ks_, -1)[..., None, :]         # (N,L,KF,1,C)
    values = jnp.stack(vs, -1)                      # (N,L,KF,C)
    scores = jnp.matmul(queries, keys) / KF ** 0.5  # (N,L,KF,C,C)
    attention = jax.nn.softmax(scores, -1)
    context = jnp.einsum("ijklm,ijkl->ijkm", attention, values)
    context = jnp.swapaxes(context, -2, -1)         # (N,L,C,KF)
    out = hp(context, p["wfc"]) + p["bfc"]
    out = out.reshape(x.shape[0], x.shape[1], C * KF)
    x2 = out + x
    y = ln(x2, p["ln2w"], p["ln2b"])
    h = jax.nn.gelu(hp(y, p["w1"]) + p["b1"], approximate=False)
    y2 = hp(h, p["w2"]) + p["b2"]
    return x2 + y2


if __name__ == "__main__":
    N, L = 2, 8
    in_channels, k_factor = 4, 8
    hidden = in_channels * k_factor      # 32
    mlp_dim = 64

    key = jax.random.PRNGKey(0)
    kp, kx = jax.random.split(key)
    params = init_params(kp, in_channels, k_factor, hidden, mlp_dim)
    x = jax.random.normal(kx, (N, L, hidden), dtype=jnp.float32)

    out = encoder_block_pallas(x, params, in_channels=in_channels,
                               k_factor=k_factor, mlp_dim=mlp_dim)
    out = jax.block_until_ready(out)

    ref = encoder_block_ref(x, params, in_channels=in_channels,
                            k_factor=k_factor, mlp_dim=mlp_dim)
    np.testing.assert_allclose(np.asarray(out), np.asarray(ref), rtol=2e-2, atol=2e-2)
    print("KERNEL_OK")
</pallas_src>

<mosaic_0001>
module attributes {stable_mosaic.version = 11 : i64} {
  func.func @_encoder_kernel(%arg0: i32, %arg1: memref<32x128xf32, #tpu.memory_space<vmem>>, %arg2: memref<32x1xf32, #tpu.memory_space<vmem>>, %arg3: memref<32x1xf32, #tpu.memory_space<vmem>>, %arg4: memref<96x32xbf16, #tpu.memory_space<vmem>>, %arg5: memref<96x1xf32, #tpu.memory_space<vmem>>, %arg6: memref<32x32xbf16, #tpu.memory_space<vmem>>, %arg7: memref<32x1xf32, #tpu.memory_space<vmem>>, %arg8: memref<32x1xf32, #tpu.memory_space<vmem>>, %arg9: memref<32x1xf32, #tpu.memory_space<vmem>>, %arg10: memref<64x32xbf16, #tpu.memory_space<vmem>>, %arg11: memref<64x1xf32, #tpu.memory_space<vmem>>, %arg12: memref<32x64xbf16, #tpu.memory_space<vmem>>, %arg13: memref<32x1xf32, #tpu.memory_space<vmem>>, %arg14: memref<32x128xf32, #tpu.memory_space<vmem>>) attributes {dimension_semantics = [#tpu.dimension_semantics<parallel>], iteration_bounds = array<i64: 1>, scalar_prefetch = 0 : i64, scratch_operands = 0 : i64, tpu.core_type = #tpu.core_type<tc>, window_params = [{transform_indices = @transform_0, window_bounds = array<i64: 32, 128>}, {pipeline_mode = #tpu.pipeline_mode<synchronous>, transform_indices = @transform_1, window_bounds = array<i64: 32, 1>}, {pipeline_mode = #tpu.pipeline_mode<synchronous>, transform_indices = @transform_2, window_bounds = array<i64: 32, 1>}, {pipeline_mode = #tpu.pipeline_mode<synchronous>, transform_indices = @transform_3, window_bounds = array<i64: 96, 32>}, {pipeline_mode = #tpu.pipeline_mode<synchronous>, transform_indices = @transform_4, window_bounds = array<i64: 96, 1>}, {pipeline_mode = #tpu.pipeline_mode<synchronous>, transform_indices = @transform_5, window_bounds = array<i64: 32, 32>}, {pipeline_mode = #tpu.pipeline_mode<synchronous>, transform_indices = @transform_6, window_bounds = array<i64: 32, 1>}, {pipeline_mode = #tpu.pipeline_mode<synchronous>, transform_indices = @transform_7, window_bounds = array<i64: 32, 1>}, {pipeline_mode = #tpu.pipeline_mode<synchronous>, transform_indices = @transform_8, window_bounds = array<i64: 32, 1>}, {pipeline_mode = #tpu.pipeline_mode<synchronous>, transform_indices = @transform_9, window_bounds = array<i64: 64, 32>}, {pipeline_mode = #tpu.pipeline_mode<synchronous>, transform_indices = @transform_10, window_bounds = array<i64: 64, 1>}, {pipeline_mode = #tpu.pipeline_mode<synchronous>, transform_indices = @transform_11, window_bounds = array<i64: 32, 64>}, {pipeline_mode = #tpu.pipeline_mode<synchronous>, transform_indices = @transform_12, window_bounds = array<i64: 32, 1>}, {transform_indices = @transform_13, window_bounds = array<i64: 32, 128>}]} {
    %c0 = arith.constant 0 : index
    %c0_0 = arith.constant 0 : index
    %0 = vector.load %arg1[%c0, %c0_0] : memref<32x128xf32, #tpu.memory_space<vmem>>, vector<32x128xf32>
    %c0_1 = arith.constant 0 : index
    %c0_2 = arith.constant 0 : index
    %1 = vector.load %arg2[%c0_1, %c0_2] : memref<32x1xf32, #tpu.memory_space<vmem>>, vector<32x1xf32>
    %c0_3 = arith.constant 0 : index
    %c0_4 = arith.constant 0 : index
    %2 = vector.load %arg3[%c0_3, %c0_4] : memref<32x1xf32, #tpu.memory_space<vmem>>, vector<32x1xf32>
    %cst = arith.constant dense<0.000000e+00> : vector<128xf32>
    %3 = vector.multi_reduction <add>, %0, %cst [0] : vector<32x128xf32> to vector<128xf32>
    %4 = vector.shape_cast %3 : vector<128xf32> to vector<1x128xf32>
    %cst_5 = arith.constant 3.200000e+01 : f32
    %5 = vector.broadcast %cst_5 : f32 to vector<1x128xf32>
    %6 = arith.divf %4, %5 : vector<1x128xf32>
    %7 = vector.broadcast %6 : vector<1x128xf32> to vector<32x128xf32>
    %8 = arith.subf %0, %7 : vector<32x128xf32>
    %9 = arith.mulf %8, %8 : vector<32x128xf32>
    %cst_6 = arith.constant dense<0.000000e+00> : vector<128xf32>
    %10 = vector.multi_reduction <add>, %9, %cst_6 [0] : vector<32x128xf32> to vector<128xf32>
    %11 = vector.shape_cast %10 : vector<128xf32> to vector<1x128xf32>
    %cst_7 = arith.constant 3.200000e+01 : f32
    %12 = vector.broadcast %cst_7 : f32 to vector<1x128xf32>
    %13 = arith.divf %11, %12 : vector<1x128xf32>
    %cst_8 = arith.constant 9.99999997E-7 : f32
    %14 = vector.broadcast %cst_8 : f32 to vector<1x128xf32>
    %15 = arith.addf %13, %14 : vector<1x128xf32>
    %16 = math.rsqrt %15 : vector<1x128xf32>
    %17 = vector.broadcast %16 : vector<1x128xf32> to vector<32x128xf32>
    %18 = arith.mulf %8, %17 : vector<32x128xf32>
    %19 = vector.broadcast %1 : vector<32x1xf32> to vector<32x128xf32>
    %20 = arith.mulf %18, %19 : vector<32x128xf32>
    %21 = vector.broadcast %2 : vector<32x1xf32> to vector<32x128xf32>
    %22 = arith.addf %20, %21 : vector<32x128xf32>
    %c0_9 = arith.constant 0 : index
    %c0_10 = arith.constant 0 : index
    %23 = vector.load %arg4[%c0_9, %c0_10] : memref<96x32xbf16, #tpu.memory_space<vmem>>, vector<96x32xbf16>
    %24 = arith.truncf %22 : vector<32x128xf32> to vector<32x128xbf16>
    %cst_11 = arith.constant dense<0.000000e+00> : vector<96x128xf32>
    %25 = tpu.matmul %23, %24, %cst_11 {dimension_numbers = #tpu.dot_dimension_numbers<[1], [0], [0], [1], [0, 0, 1, 1], [], []>} : vector<96x32xbf16>, vector<32x128xbf16>, vector<96x128xf32> -> vector<96x128xf32>
    %c0_12 = arith.constant 0 : index
    %c0_13 = arith.constant 0 : index
    %26 = vector.load %arg5[%c0_12, %c0_13] : memref<96x1xf32, #tpu.memory_space<vmem>>, vector<96x1xf32>
    %27 = vector.broadcast %26 : vector<96x1xf32> to vector<96x128xf32>
    %28 = arith.addf %25, %27 : vector<96x128xf32>
    %29 = vector.extract_strided_slice %28 {offsets = [0, 0], sizes = [32, 128], strides = [1, 1]} : vector<96x128xf32> to vector<32x128xf32>
    %cst_14 = arith.constant 0.353553385 : f32
    %30 = vector.broadcast %cst_14 : f32 to vector<32x128xf32>
    %31 = arith.mulf %29, %30 : vector<32x128xf32>
    %32 = vector.extract_strided_slice %28 {offsets = [32, 0], sizes = [32, 128], strides = [1, 1]} : vector<96x128xf32> to vector<32x128xf32>
    %33 = vector.extract_strided_slice %28 {offsets = [64, 0], sizes = [32, 128], strides = [1, 1]} : vector<96x128xf32> to vector<32x128xf32>
    %34 = arith.mulf %31, %32 : vector<32x128xf32>
    %35 = vector.extract_strided_slice %32 {offsets = [24, 0], sizes = [8, 128], strides = [1, 1]} : vector<32x128xf32> to vector<8x128xf32>
    %36 = vector.extract_strided_slice %32 {offsets = [0, 0], sizes = [24, 128], strides = [1, 1]} : vector<32x128xf32> to vector<24x128xf32>
    %37 = tpu.concatenate %35, %36 in 0 : vector<8x128xf32>, vector<24x128xf32> -> vector<32x128xf32>
    %38 = arith.mulf %31, %37 : vector<32x128xf32>
    %39 = vector.extract_strided_slice %32 {offsets = [16, 0], sizes = [16, 128], strides = [1, 1]} : vector<32x128xf32> to vector<16x128xf32>
    %40 = vector.extract_strided_slice %32 {offsets = [0, 0], sizes = [16, 128], strides = [1, 1]} : vector<32x128xf32> to vector<16x128xf32>
    %41 = tpu.concatenate %39, %40 in 0 : vector<16x128xf32>, vector<16x128xf32> -> vector<32x128xf32>
    %42 = arith.mulf %31, %41 : vector<32x128xf32>
    %43 = vector.extract_strided_slice %32 {offsets = [8, 0], sizes = [24, 128], strides = [1, 1]} : vector<32x128xf32> to vector<24x128xf32>
    %44 = vector.extract_strided_slice %32 {offsets = [0, 0], sizes = [8, 128], strides = [1, 1]} : vector<32x128xf32> to vector<8x128xf32>
    %45 = tpu.concatenate %43, %44 in 0 : vector<24x128xf32>, vector<8x128xf32> -> vector<32x128xf32>
    %46 = arith.mulf %31, %45 : vector<32x128xf32>
    %47 = arith.maximumf %34, %38 : vector<32x128xf32>
    %48 = arith.maximumf %47, %42 : vector<32x128xf32>
    %49 = arith.maximumf %48, %46 : vector<32x128xf32>
    %50 = arith.subf %34, %49 : vector<32x128xf32>
    %51 = math.exp %50 : vector<32x128xf32>
    %52 = arith.subf %38, %49 : vector<32x128xf32>
    %53 = math.exp %52 : vector<32x128xf32>
    %54 = arith.subf %42, %49 : vector<32x128xf32>
    %55 = math.exp %54 : vector<32x128xf32>
    %56 = arith.subf %46, %49 : vector<32x128xf32>
    %57 = math.exp %56 : vector<32x128xf32>
    %58 = arith.addf %51, %53 : vector<32x128xf32>
    %59 = arith.addf %58, %55 : vector<32x128xf32>
    %60 = arith.addf %59, %57 : vector<32x128xf32>
    %61 = tpu.reciprocal %60 {approx = true} : vector<32x128xf32> -> vector<32x128xf32>
    %62 = arith.mulf %33, %61 : vector<32x128xf32>
    %63 = arith.mulf %51, %62 : vector<32x128xf32>
    %64 = arith.mulf %53, %62 : vector<32x128xf32>
    %65 = vector.extract_strided_slice %64 {offsets = [8, 0], sizes = [24, 128], strides = [1, 1]} : vector<32x128xf32> to vector<24x128xf32>
    %66 = vector.extract_strided_slice %64 {offsets = [0, 0], sizes = [8, 128], strides = [1, 1]} : vector<32x128xf32> to vector<8x128xf32>
    %67 = tpu.concatenate %65, %66 in 0 : vector<24x128xf32>, vector<8x128xf32> -> vector<32x128xf32>
    %68 = arith.addf %63, %67 : vector<32x128xf32>
    %69 = arith.mulf %55, %62 : vector<32x128xf32>
    %70 = vector.extract_strided_slice %69 {offsets = [16, 0], sizes = [16, 128], strides = [1, 1]} : vector<32x128xf32> to vector<16x128xf32>
    %71 = vector.extract_strided_slice %69 {offsets = [0, 0], sizes = [16, 128], strides = [1, 1]} : vector<32x128xf32> to vector<16x128xf32>
    %72 = tpu.concatenate %70, %71 in 0 : vector<16x128xf32>, vector<16x128xf32> -> vector<32x128xf32>
    %73 = arith.addf %68, %72 : vector<32x128xf32>
    %74 = arith.mulf %57, %62 : vector<32x128xf32>
    %75 = vector.extract_strided_slice %74 {offsets = [24, 0], sizes = [8, 128], strides = [1, 1]} : vector<32x128xf32> to vector<8x128xf32>
    %76 = vector.extract_strided_slice %74 {offsets = [0, 0], sizes = [24, 128], strides = [1, 1]} : vector<32x128xf32> to vector<24x128xf32>
    %77 = tpu.concatenate %75, %76 in 0 : vector<8x128xf32>, vector<24x128xf32> -> vector<32x128xf32>
    %78 = arith.addf %73, %77 : vector<32x128xf32>
    %c0_15 = arith.constant 0 : index
    %c0_16 = arith.constant 0 : index
    %79 = vector.load %arg6[%c0_15, %c0_16] : memref<32x32xbf16, #tpu.memory_space<vmem>>, vector<32x32xbf16>
    %80 = arith.truncf %78 : vector<32x128xf32> to vector<32x128xbf16>
    %cst_17 = arith.constant dense<0.000000e+00> : vector<32x128xf32>
    %81 = tpu.matmul %79, %80, %cst_17 {dimension_numbers = #tpu.dot_dimension_numbers<[1], [0], [0], [1], [0, 0, 1, 1], [], []>} : vector<32x32xbf16>, vector<32x128xbf16>, vector<32x128xf32> -> vector<32x128xf32>
    %c0_18 = arith.constant 0 : index
    %c0_19 = arith.constant 0 : index
    %82 = vector.load %arg7[%c0_18, %c0_19] : memref<32x1xf32, #tpu.memory_space<vmem>>, vector<32x1xf32>
    %83 = vector.broadcast %82 : vector<32x1xf32> to vector<32x128xf32>
    %84 = arith.addf %81, %83 : vector<32x128xf32>
    %85 = arith.addf %84, %0 : vector<32x128xf32>
    %c0_20 = arith.constant 0 : index
    %c0_21 = arith.constant 0 : index
    %86 = vector.load %arg8[%c0_20, %c0_21] : memref<32x1xf32, #tpu.memory_space<vmem>>, vector<32x1xf32>
    %c0_22 = arith.constant 0 : index
    %c0_23 = arith.constant 0 : index
    %87 = vector.load %arg9[%c0_22, %c0_23] : memref<32x1xf32, #tpu.memory_space<vmem>>, vector<32x1xf32>
    %cst_24 = arith.constant dense<0.000000e+00> : vector<128xf32>
    %88 = vector.multi_reduction <add>, %85, %cst_24 [0] : vector<32x128xf32> to vector<128xf32>
    %89 = vector.shape_cast %88 : vector<128xf32> to vector<1x128xf32>
    %cst_25 = arith.constant 3.200000e+01 : f32
    %90 = vector.broadcast %cst_25 : f32 to vector<1x128xf32>
    %91 = arith.divf %89, %90 : vector<1x128xf32>
    %92 = vector.broadcast %91 : vector<1x128xf32> to vector<32x128xf32>
    %93 = arith.subf %85, %92 : vector<32x128xf32>
    %94 = arith.mulf %93, %93 : vector<32x128xf32>
    %cst_26 = arith.constant dense<0.000000e+00> : vector<128xf32>
    %95 = vector.multi_reduction <add>, %94, %cst_26 [0] : vector<32x128xf32> to vector<128xf32>
    %96 = vector.shape_cast %95 : vector<128xf32> to vector<1x128xf32>
    %cst_27 = arith.constant 3.200000e+01 : f32
    %97 = vector.broadcast %cst_27 : f32 to vector<1x128xf32>
    %98 = arith.divf %96, %97 : vector<1x128xf32>
    %cst_28 = arith.constant 9.99999997E-7 : f32
    %99 = vector.broadcast %cst_28 : f32 to vector<1x128xf32>
    %100 = arith.addf %98, %99 : vector<1x128xf32>
    %101 = math.rsqrt %100 : vector<1x128xf32>
    %102 = vector.broadcast %101 : vector<1x128xf32> to vector<32x128xf32>
    %103 = arith.mulf %93, %102 : vector<32x128xf32>
    %104 = vector.broadcast %86 : vector<32x1xf32> to vector<32x128xf32>
    %105 = arith.mulf %103, %104 : vector<32x128xf32>
    %106 = vector.broadcast %87 : vector<32x1xf32> to vector<32x128xf32>
    %107 = arith.addf %105, %106 : vector<32x128xf32>
    %c0_29 = arith.constant 0 : index
    %c0_30 = arith.constant 0 : index
    %108 = vector.load %arg10[%c0_29, %c0_30] : memref<64x32xbf16, #tpu.memory_space<vmem>>, vector<64x32xbf16>
    %109 = arith.truncf %107 : vector<32x128xf32> to vector<32x128xbf16>
    %cst_31 = arith.constant dense<0.000000e+00> : vector<64x128xf32>
    %110 = tpu.matmul %108, %109, %cst_31 {dimension_numbers = #tpu.dot_dimension_numbers<[1], [0], [0], [1], [0, 0, 1, 1], [], []>} : vector<64x32xbf16>, vector<32x128xbf16>, vector<64x128xf32> -> vector<64x128xf32>
    %c0_32 = arith.constant 0 : index
    %c0_33 = arith.constant 0 : index
    %111 = vector.load %arg11[%c0_32, %c0_33] : memref<64x1xf32, #tpu.memory_space<vmem>>, vector<64x1xf32>
    %112 = vector.broadcast %111 : vector<64x1xf32> to vector<64x128xf32>
    %113 = arith.addf %110, %112 : vector<64x128xf32>
    %cst_34 = arith.constant 5.000000e-01 : f32
    %114 = vector.broadcast %cst_34 : f32 to vector<64x128xf32>
    %115 = arith.mulf %114, %113 : vector<64x128xf32>
    %cst_35 = arith.constant 4.471500e-02 : f32
    %116 = vector.broadcast %cst_35 : f32 to vector<64x128xf32>
    %117 = arith.mulf %116, %113 : vector<64x128xf32>
    %118 = arith.mulf %117, %113 : vector<64x128xf32>
    %119 = arith.mulf %118, %113 : vector<64x128xf32>
    %120 = arith.addf %113, %119 : vector<64x128xf32>
    %cst_36 = arith.constant 0.797884583 : f32
    %121 = vector.broadcast %cst_36 : f32 to vector<64x128xf32>
    %122 = arith.mulf %121, %120 : vector<64x128xf32>
    %123 = math.tanh %122 : vector<64x128xf32>
    %cst_37 = arith.constant 1.000000e+00 : f32
    %124 = vector.broadcast %cst_37 : f32 to vector<64x128xf32>
    %125 = arith.addf %124, %123 : vector<64x128xf32>
    %126 = arith.mulf %115, %125 : vector<64x128xf32>
    %c0_38 = arith.constant 0 : index
    %c0_39 = arith.constant 0 : index
    %127 = vector.load %arg12[%c0_38, %c0_39] : memref<32x64xbf16, #tpu.memory_space<vmem>>, vector<32x64xbf16>
    %128 = arith.truncf %126 : vector<64x128xf32> to vector<64x128xbf16>
    %cst_40 = arith.constant dense<0.000000e+00> : vector<32x128xf32>
    %129 = tpu.matmul %127, %128, %cst_40 {dimension_numbers = #tpu.dot_dimension_numbers<[1], [0], [0], [1], [0, 0, 1, 1], [], []>} : vector<32x64xbf16>, vector<64x128xbf16>, vector<32x128xf32> -> vector<32x128xf32>
    %c0_41 = arith.constant 0 : index
    %c0_42 = arith.constant 0 : index
    %130 = vector.load %arg13[%c0_41, %c0_42] : memref<32x1xf32, #tpu.memory_space<vmem>>, vector<32x1xf32>
    %131 = vector.broadcast %130 : vector<32x1xf32> to vector<32x128xf32>
    %132 = arith.addf %129, %131 : vector<32x128xf32>
    %133 = arith.addf %85, %132 : vector<32x128xf32>
    %c0_43 = arith.constant 0 : index
    %c0_44 = arith.constant 0 : index
    %134 = vector.load %arg14[%c0_43, %c0_44] : memref<32x128xf32, #tpu.memory_space<vmem>>, vector<32x128xf32>
    tpu.vector_store %arg14[%c0_43, %c0_44], %133 {strides = array<i32>} : memref<32x128xf32, #tpu.memory_space<vmem>>, vector<32x128xf32>,
    return
  }
  func.func @transform_0(%arg0: i32) -> (i32, i32) {
    %c0_i32 = arith.constant 0 : i32
    %c0_i32_0 = arith.constant 0 : i32
    return %c0_i32, %arg0 : i32, i32
  }
  func.func @transform_1(%arg0: i32) -> (i32, i32) {
    %c0_i32 = arith.constant 0 : i32
    %c0_i32_0 = arith.constant 0 : i32
    %c0_i32_1 = arith.constant 0 : i32
    return %c0_i32, %c0_i32_0 : i32, i32
  }
  func.func @transform_2(%arg0: i32) -> (i32, i32) {
    %c0_i32 = arith.constant 0 : i32
    %c0_i32_0 = arith.constant 0 : i32
    %c0_i32_1 = arith.constant 0 : i32
    return %c0_i32, %c0_i32_0 : i32, i32
  }
  func.func @transform_3(%arg0: i32) -> (i32, i32) {
    %c0_i32 = arith.constant 0 : i32
    %c0_i32_0 = arith.constant 0 : i32
    %c0_i32_1 = arith.constant 0 : i32
    return %c0_i32, %c0_i32_0 : i32, i32
  }
  func.func @transform_4(%arg0: i32) -> (i32, i32) {
    %c0_i32 = arith.constant 0 : i32
    %c0_i32_0 = arith.constant 0 : i32
    %c0_i32_1 = arith.constant 0 : i32
    return %c0_i32, %c0_i32_0 : i32, i32
  }
  func.func @transform_5(%arg0: i32) -> (i32, i32) {
    %c0_i32 = arith.constant 0 : i32
    %c0_i32_0 = arith.constant 0 : i32
    %c0_i32_1 = arith.constant 0 : i32
    return %c0_i32, %c0_i32_0 : i32, i32
  }
  func.func @transform_6(%arg0: i32) -> (i32, i32) {
    %c0_i32 = arith.constant 0 : i32
    %c0_i32_0 = arith.constant 0 : i32
    %c0_i32_1 = arith.constant 0 : i32
    return %c0_i32, %c0_i32_0 : i32, i32
  }
  func.func @transform_7(%arg0: i32) -> (i32, i32) {
    %c0_i32 = arith.constant 0 : i32
    %c0_i32_0 = arith.constant 0 : i32
    %c0_i32_1 = arith.constant 0 : i32
    return %c0_i32, %c0_i32_0 : i32, i32
  }
  func.func @transform_8(%arg0: i32) -> (i32, i32) {
    %c0_i32 = arith.constant 0 : i32
    %c0_i32_0 = arith.constant 0 : i32
    %c0_i32_1 = arith.constant 0 : i32
    return %c0_i32, %c0_i32_0 : i32, i32
  }
  func.func @transform_9(%arg0: i32) -> (i32, i32) {
    %c0_i32 = arith.constant 0 : i32
    %c0_i32_0 = arith.constant 0 : i32
    %c0_i32_1 = arith.constant 0 : i32
    return %c0_i32, %c0_i32_0 : i32, i32
  }
  func.func @transform_10(%arg0: i32) -> (i32, i32) {
    %c0_i32 = arith.constant 0 : i32
    %c0_i32_0 = arith.constant 0 : i32
    %c0_i32_1 = arith.constant 0 : i32
    return %c0_i32, %c0_i32_0 : i32, i32
  }
  func.func @transform_11(%arg0: i32) -> (i32, i32) {
    %c0_i32 = arith.constant 0 : i32
    %c0_i32_0 = arith.constant 0 : i32
    %c0_i32_1 = arith.constant 0 : i32
    return %c0_i32, %c0_i32_0 : i32, i32
  }
  func.func @transform_12(%arg0: i32) -> (i32, i32) {
    %c0_i32 = arith.constant 0 : i32
    %c0_i32_0 = arith.constant 0 : i32
    %c0_i32_1 = arith.constant 0 : i32
    return %c0_i32, %c0_i32_0 : i32, i32
  }
  func.func @transform_13(%arg0: i32) -> (i32, i32) {
    %c0_i32 = arith.constant 0 : i32
    %c0_i32_0 = arith.constant 0 : i32
    return %c0_i32, %arg0 : i32, i32
  }
}

</mosaic_0001>

<bundles_post_ra>
// kernel: tpu_custom_call.1
= control target key start
LH: loop header
LB: loop body
LE: loop exit
PB: predicated region body
PF: predicated region fallthrough
CT: control target
= control target key end

     0   :  { %v1227_v2 = vmov 0   ;;  %vm257_vm0 = vcmask 261120   ;;  %s1623_s0 = inlined_call_operand.vmem [shape: f32[32,128], index: 0, kind: input, shape index: {}]   ;;  %s1624_s1 = inlined_call_operand.vmem [shape: f32[32,1], index: 1, kind: input, shape index: {}]   ;;  %s1625_s2 = inlined_call_operand.vmem [shape: f32[32,1], index: 2, kind: input, shape index: {}]   ;;  %s1626_s3 = inlined_call_operand.vmem [shape: bf16[96,32], index: 3, kind: input, shape index: {}]   ;;  %s1627_s4 = inlined_call_operand.vmem [shape: f32[96,1], index: 4, kind: input, shape index: {}]   ;;  %s1628_s5 = inlined_call_operand.vmem [shape: bf16[32,32], index: 5, kind: input, shape index: {}]   ;;  %s1629_s6 = inlined_call_operand.vmem [shape: f32[32,1], index: 6, kind: input, shape index: {}]   ;;  %s1630_s7 = inlined_call_operand.vmem [shape: f32[32,1], index: 7, kind: input, shape index: {}]   ;;  %s1631_s8 = inlined_call_operand.vmem [shape: f32[32,1], index: 8, kind: input, shape index: {}]   ;;  %s1632_s9 = inlined_call_operand.vmem [shape: bf16[64,32], index: 9, kind: input, shape index: {}]   ;;  %s1633_s10 = inlined_call_operand.vmem [shape: f32[64,1], index: 10, kind: input, shape index: {}]   ;;  %s1634_s11 = inlined_call_operand.vmem [shape: bf16[32,64], index: 11, kind: input, shape index: {}]   ;;  %s1635_s12 = inlined_call_operand.vmem [shape: f32[32,1], index: 12, kind: input, shape index: {}]   ;;  %s1636_s13 = inlined_call_operand.hbm [shape: f32[32,128], index: 13, kind: output, shape index: {}]  }
   0x1   :  { %v54_v0 = vld [vmem:[%s1625_s2] sm:$0xff]  ;;  %1128 = vset.pattern.permute.xlu1 %v1227_v2  ;;  %1127 = vset.pattern.permute.xlu0 %v1227_v2  ;;  %v55_v3 = vld [vmem:[%s1625_s2 + $0x8] sm:$0xff]  ;;  %v53_v5 = vld [vmem:[%s1624_s1 + $0x18] sm:$0xff] }
   0x2   :  { %v50_v1 = vld [vmem:[%s1624_s1] sm:$0xff]  ;;  %119 = vperm.xlu1 %1128, %v54_v0   ;;  %v51_v4 = vld [vmem:[%s1624_s1 + $0x8] sm:$0xff]  ;;  %v52_v6 = vld [vmem:[%s1624_s1 + $0x10] sm:$0xff] }
   0x3   :  { %95 = vperm.xlu0 %1127, %v50_v1   ;;  %v57_v7 = vld [vmem:[%s1625_s2 + $0x18] sm:$0xff]  ;;  %v56_v8 = vld [vmem:[%s1625_s2 + $0x10] sm:$0xff]  ;;  %v156_v9 = vld [vmem:[%s1627_s4 + $0x8] sm:$0xff] }
   0x4   :  { %v155_v10 = vld [vmem:[%s1627_s4] sm:$0xff]  ;;  %v158_v11 = vld [vmem:[%s1627_s4 + $0x18] sm:$0xff]  ;;  %v157_v12 = vld [vmem:[%s1627_s4 + $0x10] sm:$0xff] }
   0x5   :  { %v1340_v13 = vld [vmem:[%s1623_s0] sm:$0xff]  ;;  %v1348_v15 = vld [vmem:[%s1623_s0 + $0x8] sm:$0xff]  ;;  %v1360_v18 = vld [vmem:[%s1623_s0 + $0x10] sm:$0xff] }
   0x6   :  { %124 = vperm.xlu1 %1128, %v55_v3   ;;  %v1129_v14 = vld [vmem:[%s1626_s3] sm:$0xff]   ;;  %v160_v16 = vld [vmem:[%s1627_s4 + $0x28] sm:$0xff]  ;;  %v58_v19 = vadd.f32 %v1348_v15, %v1340_v13 }
   0x7   :  { %100 = vperm.xlu0 %1127, %v51_v4   ;;  %v159_v17 = vld [vmem:[%s1627_s4 + $0x20] sm:$0xff]  ;;  %1079 = vmatprep.mubr.msk.bf16.mxu0 %vm257_vm0, %v1129_v14 }
   0xa   :  { %110 = vperm.xlu1 %1128, %v53_v5  }
   0xb   :  { %105 = vperm.xlu0 %1127, %v52_v6  }
   0xe   :  { %134 = vperm.xlu1 %1128, %v57_v7  }
   0xf   :  { %129 = vperm.xlu0 %1127, %v56_v8  }
  0x12   :  { %174 = vperm.xlu1 %1128, %v156_v9  }
  0x13   :  { %169 = vperm.xlu0 %1127, %v155_v10  }
  0x16   :  { %184 = vperm.xlu1 %1128, %v158_v11  }
  0x17   :  { %179 = vperm.xlu0 %1127, %v157_v12  }
  0x1a   :  { %194 = vperm.xlu1 %1128, %v160_v16  }
  0x1b   :  { %189 = vperm.xlu0 %1127, %v159_v17  }
  0x1c   :  { %18 = vsyncpa [#allocation3], 0  ;;  %v162_v20 = vld [vmem:[%s1627_s4 + $0x38] sm:$0xff]  ;;  %v161_v21 = vld [vmem:[%s1627_s4 + $0x30] sm:$0xff]  ;;  %v59_v22 = vadd.f32 %v58_v19, %v1360_v18  ;;  %vm943_vm1 = vcmask 523264   ;;  %s1228_s18 = smov [#allocation2]  }
  0x1d   :  { %v1374_v23 = vld [vmem:[%s1623_s0 + $0x18] sm:$0xff]  ;;  %v164_v24 = vld [vmem:[%s1627_s4 + $0x48] sm:$0xff]  ;;  %v163_v25 = vld [vmem:[%s1627_s4 + $0x40] sm:$0xff] }
  0x1e   :  { %204 = vperm.xlu1 %1128, %v162_v20   ;;  %v60_v26 = vadd.f32 %v59_v22, %v1374_v23  ;;  %v166_v27 = vld [vmem:[%s1627_s4 + $0x58] sm:$0xff]  ;;  %v165_v28 = vld [vmem:[%s1627_s4 + $0x50] sm:$0xff]  ;;  %v492_v30 = vld [vmem:[%s1629_s6 + $0x8] sm:$0xff] }
  0x1f   :  { %199 = vperm.xlu0 %1127, %v161_v21   ;;  %v491_v31 = vld [vmem:[%s1629_s6] sm:$0xff]  ;;  %v494_v33 = vld [vmem:[%s1629_s6 + $0x18] sm:$0xff]  ;;  %v493_v34 = vld [vmem:[%s1629_s6 + $0x10] sm:$0xff] }
  0x20   :  { %v61_v29 = vrot.slane %v60_v26, 4  ;;  %v585_v36 = vld [vmem:[%s1630_s7 + $0x8] sm:$0xff]  ;;  %v584_v37 = vld [vmem:[%s1630_s7] sm:$0xff]  ;;  %v587_v42 = vld [vmem:[%s1630_s7 + $0x18] sm:$0xff] }
  0x21   :  { %v589_v39 = vld [vmem:[%s1631_s8 + $0x8] sm:$0xff]  ;;  %v588_v40 = vld [vmem:[%s1631_s8] sm:$0xff]  ;;  %v586_v43 = vld [vmem:[%s1630_s7 + $0x10] sm:$0xff] }
  0x22   :  { %214 = vperm.xlu1 %1128, %v164_v24   ;;  %v62_v32 = vadd.f32 %v61_v29, %v60_v26  ;;  %v591_v45 = vld [vmem:[%s1631_s8 + $0x18] sm:$0xff]  ;;  %v590_v46 = vld [vmem:[%s1631_s8 + $0x10] sm:$0xff]  ;;  %v685_v48 = vld [vmem:[%s1633_s10 + $0x8] sm:$0xff] }
  0x23   :  { %209 = vperm.xlu0 %1127, %v163_v25   ;;  %v684_v49 = vld [vmem:[%s1633_s10] sm:$0xff]  ;;  %v687_v52 = vld [vmem:[%s1633_s10 + $0x18] sm:$0xff]  ;;  %v686_v53 = vld [vmem:[%s1633_s10 + $0x10] sm:$0xff] }
  0x24   :  { %v63_v35 = vrot.slane %v62_v32, 2  ;;  %v689_v57 = vld [vmem:[%s1633_s10 + $0x28] sm:$0xff]  ;;  %v688_v58 = vld [vmem:[%s1633_s10 + $0x20] sm:$0xff]  ;;  %v691_v62 = vld [vmem:[%s1633_s10 + $0x38] sm:$0xff] }
  0x25   :  { %v690_v63 = vld [vmem:[%s1633_s10 + $0x30] sm:$0xff]  ;;  %v910_v2 = vld [vmem:[%s1635_s12 + $0x8] sm:$0xff]  ;;  %v909_v3 = vld [vmem:[%s1635_s12] sm:$0xff]  ;;  %s1012_s10 = sshll.u32 %s1228_s18, 4  ;;  %s1013_s10 = int_to_ptr.vmem [resolvable:$true] %s1012_s10 }
  0x26   :  { %224 = vperm.xlu1 %1128, %v166_v27   ;;  %v64_v38 = vadd.f32 %v63_v35, %v62_v32  ;;  %v912_v5 = vld [vmem:[%s1635_s12 + $0x18] sm:$0xff]  ;;  %v911_v6 = vld [vmem:[%s1635_s12 + $0x10] sm:$0xff]  ;;  %p1208_p1 = scmp.lt.s32.totalorder %s1013_s10, %s1013_s10 }
  0x27   :  { %219 = vperm.xlu0 %1127, %v165_v28  }
  0x28   :  { %v65_v41 = vrot.slane %v64_v38, 1 }
  0x2a   :  { %502 = vperm.xlu1 %1128, %v492_v30   ;;  %v66_v44 = vadd.f32 %v65_v41, %v64_v38 }
  0x2b   :  { %497 = vperm.xlu0 %1127, %v491_v31  }
  0x2c   :  { %v68_v47 = vmul.f32 0.03125, %v66_v44  ;;  %v1132_v44 = vld [vmem:[%s1626_s3 + $0x18] sm:$0xff]  }
  0x2e   :  { %512 = vperm.xlu1 %1128, %v494_v33   ;;  %v69_v50 = vsub.f32 %v1340_v13, %v68_v47  ;;  %v70_v51 = vsub.f32 %v1348_v15, %v68_v47  ;;  %v71_v54 = vsub.f32 %v1360_v18, %v68_v47  ;;  %v72_v59 = vsub.f32 %v1374_v23, %v68_v47  ;;  %v1135_v47 = vld [vmem:[%s1628_s5] sm:$0xff]  }
  0x2f   :  { %507 = vperm.xlu0 %1127, %v493_v34   ;;  %1095 = vmatprep.mubr.msk.bf16.mxu1 %vm257_vm0, %v1135_v47 }
  0x30   :  { %v73_v55 = vmul.f32 %v69_v50, %v69_v50  ;;  %v74_v56 = vmul.f32 %v70_v51, %v70_v51  ;;  %v75_v60 = vmul.f32 %v71_v54, %v71_v54  ;;  %v76_v0 = vmul.f32 %v72_v59, %v72_v59 }
  0x32   :  { %633 = vperm.xlu1 %1128, %v585_v36   ;;  %v77_v61 = vadd.f32 %v74_v56, %v73_v55 }
  0x33   :  { %628 = vperm.xlu0 %1127, %v584_v37  }
  0x34   :  { %v78_v1 = vadd.f32 %v77_v61, %v75_v60 }
  0x36   :  { %657 = vperm.xlu1 %1128, %v589_v39   ;;  %v79_v4 = vadd.f32 %v78_v1, %v76_v0 }
  0x37   :  { %652 = vperm.xlu0 %1127, %v588_v40  }
  0x38   :  { %v80_v7 = vrot.slane %v79_v4, 4 }
  0x3a   :  { %643 = vperm.xlu1 %1128, %v587_v42   ;;  %v81_v8 = vadd.f32 %v80_v7, %v79_v4  ;;  %v1130_v42 = vld [vmem:[%s1626_s3 + $0x8] sm:$0xff]  }
  0x3b   :  { %638 = vperm.xlu0 %1127, %v586_v43   ;;  %v1131_v43 = vld [vmem:[%s1626_s3 + $0x10] sm:$0xff]  }
  0x3c   :  { %v82_v9 = vrot.slane %v81_v8, 2 }
  0x3e   :  { %667 = vperm.xlu1 %1128, %v591_v45   ;;  %v83_v10 = vadd.f32 %v82_v9, %v81_v8  ;;  %v1133_v45 = vld [vmem:[%s1626_s3 + $0x20] sm:$0xff]  }
  0x3f   :  { %662 = vperm.xlu0 %1127, %v590_v46   ;;  %v1134_v46 = vld [vmem:[%s1626_s3 + $0x28] sm:$0xff]  }
  0x40   :  { %v84_v11 = vrot.slane %v83_v10, 1 }
  0x42   :  { %699 = vperm.xlu1 %1128, %v685_v48   ;;  %v85_v12 = vadd.f32 %v84_v11, %v83_v10 }
  0x43   :  { %694 = vperm.xlu0 %1127, %v684_v49  }
  0x44   :  { %v86_v14 = vmul.f32 0.03125, %v85_v12 }
  0x46   :  { %709 = vperm.xlu1 %1128, %v687_v52   ;;  %v87_v16 = vadd.f32 1e-06, %v86_v14 }
  0x47   :  { %704 = vperm.xlu0 %1127, %v686_v53  }
  0x48   :  { %1143 = vrsqrt.f32 %v87_v16 }
  0x4a   :  { %719 = vperm.xlu1 %1128, %v689_v57  }
  0x4b   :  { %714 = vperm.xlu0 %1127, %v688_v58  }
  0x4e   :  { %729 = vperm.xlu1 %1128, %v691_v62  }
  0x4f   :  { %724 = vperm.xlu0 %1127, %v690_v63  }
  0x52   :  { %920 = vperm.xlu1 %1128, %v910_v2   ;;  %v1144_v17 = vpop.eup %1143 }
  0x53   :  { %915 = vperm.xlu0 %1127, %v909_v3   ;;  %v89_v19 = vmul.f32 %v1144_v17, %v69_v50  ;;  %v90_v22 = vmul.f32 %v1144_v17, %v70_v51  ;;  %v92_v30 = vmul.f32 %v1144_v17, %v72_v59  ;;  %v91_v31 = vmul.f32 %v1144_v17, %v71_v54 }
  0x56   :  { %930 = vperm.xlu1 %1128, %v912_v5  }
  0x57   :  { %925 = vperm.xlu0 %1127, %v911_v6  }
  0x81   :  { %v120_v20 = vpop.permute.xlu1 %119 }
  0x82   :  { %v96_v21 = vpop.permute.xlu0 %95 }
  0x83   :  { %v113_v24 = vmul.f32 %v96_v21, %v89_v19 }
  0x85   :  { %v125_v25 = vpop.permute.xlu1 %124  ;;  %v137_v28 = vadd.f32 %v120_v20, %v113_v24 }
  0x86   :  { %v101_v26 = vpop.permute.xlu0 %100 }
  0x87   :  { %v114_v27 = vmul.f32 %v101_v26, %v90_v22 }
  0x89   :  { %v138_v29 = vadd.f32 %v125_v25, %v114_v27  ;;  %v111_v32 = vpop.permute.xlu1 %110 }
  0x8a   :  { %v106_v33 = vpop.permute.xlu0 %105  ;;  %v116_v35 = vmul.f32 %v111_v32, %v92_v30 }
  0x8b   :  { %v153_v34 = vpack.c.bf16 %v138_v29, %v137_v28  ;;  %v115_v36 = vmul.f32 %v106_v33, %v91_v31 }
  0x8d   :  { %1075 = vmatprep.subr.bf16.mxu0 %v153_v34  ;;  %v135_v37 = vpop.permute.xlu1 %134 }
  0x8e   :  { %v130_v38 = vpop.permute.xlu0 %129  ;;  %1076 = vmatpush3.bf16.msra.mxu0 %v153_v34  ;;  %v140_v39 = vadd.f32 %v135_v37, %v116_v35 }
  0x8f   :  { %v139_v40 = vadd.f32 %v130_v38, %v115_v36 }
  0x91   :  { %v154_v41 = vpack.c.bf16 %v140_v39, %v139_v40  ;;  %v175_v49 = vpop.permute.xlu1 %174 }
  0x92   :  { %v170_v48 = vpop.permute.xlu0 %169 }
  0x93   :  { %1077 = vmatprep.subr.bf16.mxu0 %v154_v41 }
  0x94   :  { %1078 = vmatpush3.bf16.msra.mxu0 %v154_v41 }
  0x95   :  { %v185_v51 = vpop.permute.xlu1 %184 }
  0x96   :  { %v180_v50 = vpop.permute.xlu0 %179 }
  0x97   :  { %1080 = vmatmul.mubr.msk.bf16.vlgmr.msra.gmra.mrb[0].mxu0 %vm257_vm0, %v1130_v42 }
  0x98   :  { %1083 = vmatprep.mubr.msk.bf16.mxu0 %vm257_vm0, %v1131_v43 }
  0x99   :  { %v195_v61 = vpop.permute.xlu1 %194 }
  0x9a   :  { %v190_v54 = vpop.permute.xlu0 %189 }
  0x9d   :  { %v205_v14 = vpop.permute.xlu1 %204 }
  0x9e   :  { %v200_v62 = vpop.permute.xlu0 %199 }
  0x9f   :  { %1084 = vmatmul.mubr.msk.bf16.gmra.mrb[4].mxu0 %vm257_vm0, %v1132_v44 }
  0xa0   :  { %1087 = vmatprep.mubr.msk.bf16.mxu0 %vm257_vm0, %v1133_v45 }
  0xa7   :  { %1088 = vmatmul.mubr.msk.bf16.gmra.mrb[8].mxu0 %vm257_vm0, %v1134_v46 }
 0x16a   :  { %v1081_v52 = vpop.f32.mrb[0].mxu0 }
 0x16b   :  { %v310_v53 = vpop.f32.mrb[1].mxu0  ;;  %v319_v57 = vadd.f32 %v1081_v52, %v180_v50 }
 0x16c   :  { %v1082_v55 = vpop.f32.mrb[2].mxu0  ;;  %v311_v58 = vadd.f32 %v310_v53, %v170_v48 }
 0x16d   :  { %v313_v56 = vpop.f32.mrb[3].mxu0  ;;  %v322_v59 = vadd.f32 %v1082_v55, %v185_v51  ;;  %v359_v63 = vmul.f32 0.35355338, %v319_v57 }
 0x16e   :  { %v314_v60 = vadd.f32 %v313_v56, %v175_v49  ;;  %v357_v0 = vmul.f32 0.35355338, %v311_v58 }
 0x16f   :  { %v360_v2 = vmul.f32 0.35355338, %v322_v59 }
 0x170   :  { %v358_v3 = vmul.f32 0.35355338, %v314_v60 }
 0x172   :  { %v1085_v1 = vpop.f32.mrb[4].mxu0 }
 0x173   :  { %v335_v4 = vadd.f32 %v1085_v1, %v200_v62  ;;  %v326_v5 = vpop.f32.mrb[5].mxu0 }
 0x174   :  { %v327_v6 = vadd.f32 %v326_v5, %v190_v54  ;;  %v1086_v7 = vpop.f32.mrb[6].mxu0 }
 0x175   :  { %v1489_v8 = vmul.f32 %v359_v63, %v335_v4  ;;  %v1491_v9 = vmul.f32 %v360_v2, %v335_v4  ;;  %v369_v10 = vmul.f32 %v357_v0, %v335_v4  ;;  %v374_v11 = vmul.f32 %v358_v3, %v335_v4  ;;  %v329_v12 = vpop.f32.mrb[7].mxu0 }
 0x176   :  { %v361_v16 = vmul.f32 %v357_v0, %v327_v6  ;;  %v366_v17 = vmul.f32 %v358_v3, %v327_v6  ;;  %v371_v19 = vmul.f32 %v359_v63, %v327_v6  ;;  %v1493_v20 = vmul.f32 %v360_v2, %v327_v6 }
 0x177   :  { %v338_v21 = vadd.f32 %v1086_v7, %v205_v14  ;;  %v330_v22 = vadd.f32 %v329_v12, %v195_v61 }
 0x179   :  { %v364_v24 = vmul.f32 %v360_v2, %v338_v21  ;;  %v365_v25 = vmul.f32 %v357_v0, %v338_v21  ;;  %v370_v26 = vmul.f32 %v358_v3, %v338_v21  ;;  %v1495_v27 = vmul.f32 %v359_v63, %v338_v21 }
 0x17a   :  { %v362_v28 = vmul.f32 %v358_v3, %v330_v22  ;;  %v367_v29 = vmul.f32 %v359_v63, %v330_v22  ;;  %v372_v30 = vmul.f32 %v360_v2, %v330_v22  ;;  %v373_v31 = vmul.f32 %v357_v0, %v330_v22  ;;  %v1497_v32 = vpop.f32.mrb[8].mxu0 }
 0x17b   :  { %v377_v33 = vmax.f32 %v361_v16, %v365_v25  ;;  %v380_v34 = vmax.f32 %v364_v24, %v1491_v9  ;;  %v1500_v35 = vpop.f32.mrb[9].mxu0 }
 0x17c   :  { %v378_v36 = vmax.f32 %v362_v28, %v366_v17  ;;  %v379_v37 = vmax.f32 %v1489_v8, %v367_v29  ;;  %v1503_v38 = vpop.f32.mrb[10].mxu0 }
 0x17d   :  { %v381_v39 = vmax.f32 %v377_v33, %v369_v10  ;;  %v384_v40 = vmax.f32 %v380_v34, %v372_v30  ;;  %v1505_v41 = vpop.f32.mrb[11].mxu0 }
 0x17e   :  { %v382_v42 = vmax.f32 %v378_v36, %v370_v26  ;;  %v383_v43 = vmax.f32 %v379_v37, %v371_v19 }
 0x17f   :  { %v385_v44 = vmax.f32 %v381_v39, %v373_v31  ;;  %v388_v45 = vmax.f32 %v384_v40, %v1493_v20 }
 0x180   :  { %v386_v46 = vmax.f32 %v382_v42, %v374_v11  ;;  %v387_v47 = vmax.f32 %v383_v43, %v1495_v27 }
 0x181   :  { %v389_v48 = vsub.f32 %v361_v16, %v385_v44  ;;  %v392_v49 = vsub.f32 %v364_v24, %v388_v45  ;;  %v401_v50 = vsub.f32 %v365_v25, %v385_v44  ;;  %v404_v51 = vsub.f32 %v1491_v9, %v388_v45 }
 0x182   :  { %v390_v52 = vsub.f32 %v362_v28, %v386_v46  ;;  %v402_v53 = vsub.f32 %v366_v17, %v386_v46  ;;  %v403_v54 = vsub.f32 %v367_v29, %v387_v47  ;;  %v413_v55 = vsub.f32 %v369_v10, %v385_v44 }
 0x183   :  { %v393_v56 = vmul.f32 1.442695, %v389_v48  ;;  %v405_v57 = vmul.f32 1.442695, %v401_v50  ;;  %v414_v58 = vsub.f32 %v370_v26, %v386_v46  ;;  %v415_v61 = vsub.f32 %v371_v19, %v387_v47 }
 0x184   :  { %v395_v59 = vmul.f32 1.442695, %v390_v52  ;;  %v407_v60 = vmul.f32 1.442695, %v402_v53  ;;  %v416_v62 = vsub.f32 %v372_v30, %v388_v45  ;;  %v417_v63 = vmul.f32 1.442695, %v413_v55  ;;  %v215_v53 = vpop.permute.xlu1 %214 }
 0x185   :  { %1145 = vpow2.f32 %v393_v56  ;;  %v425_v0 = vsub.f32 %v373_v31, %v385_v44  ;;  %v419_v1 = vmul.f32 1.442695, %v414_v58  ;;  %v426_v2 = vsub.f32 %v374_v11, %v386_v46 }
 0x186   :  { %1147 = vpow2.f32 %v395_v59  ;;  %v427_v3 = vsub.f32 %v1495_v27, %v387_v47  ;;  %v428_v4 = vsub.f32 %v1493_v20, %v388_v45  ;;  %v391_v5 = vsub.f32 %v1489_v8, %v387_v47 }
 0x187   :  { %1149 = vpow2.f32 %v405_v57  ;;  %v429_v6 = vmul.f32 1.442695, %v425_v0  ;;  %v431_v7 = vmul.f32 1.442695, %v426_v2  ;;  %v409_v9 = vmul.f32 1.442695, %v403_v54 }
 0x188   :  { %1151 = vpow2.f32 %v407_v60  ;;  %v421_v10 = vmul.f32 1.442695, %v415_v61  ;;  %v397_v12 = vmul.f32 1.442695, %v391_v5  ;;  %v399_v16 = vmul.f32 1.442695, %v392_v49 }
 0x189   :  { %1153 = vpow2.f32 %v417_v63  ;;  %v411_v11 = vmul.f32 1.442695, %v404_v51  ;;  %v423_v21 = vmul.f32 1.442695, %v416_v62  ;;  %v433_v22 = vmul.f32 1.442695, %v427_v3  ;;  %v210_v51 = vpop.permute.xlu0 %209 }
 0x18a   :  { %1155 = vpow2.f32 %v419_v1  ;;  %v435_v26 = vmul.f32 1.442695, %v428_v4  ;;  %v343_v54 = vadd.f32 %v1500_v35, %v210_v51  ;;  %v346_v56 = vadd.f32 %v1505_v41, %v215_v53 }
 0x18b   :  { %1157 = vpow2.f32 %v429_v6 }
 0x18c   :  { %1159 = vpow2.f32 %v431_v7  ;;  %v225_v7 = vpop.permute.xlu1 %224 }
 0x18d   :  { %1161 = vpow2.f32 %v409_v9  ;;  %v220_v4 = vpop.permute.xlu0 %219  ;;  %v354_v41 = vadd.f32 %v1503_v38, %v225_v7 }
 0x18e   :  { %1163 = vpow2.f32 %v421_v10  ;;  %v351_v6 = vadd.f32 %v1497_v32, %v220_v4 }
 0x18f   :  { %v1146_v14 = vpop.eup %1145  ;;  %1165 = vpow2.f32 %v397_v12 }
 0x190   :  { %v1148_v17 = vpop.eup %1147  ;;  %1167 = vpow2.f32 %v399_v16 }
 0x191   :  { %v1150_v19 = vpop.eup %1149  ;;  %1169 = vpow2.f32 %v411_v11 }
 0x192   :  { %v1152_v20 = vpop.eup %1151  ;;  %v437_v8 = vadd.f32 %v1150_v19, %v1146_v14  ;;  %1171 = vpow2.f32 %v423_v21 }
 0x193   :  { %v438_v24 = vadd.f32 %v1152_v20, %v1148_v17  ;;  %v1154_v25 = vpop.eup %1153  ;;  %1173 = vpow2.f32 %v433_v22 }
 0x194   :  { %v1156_v27 = vpop.eup %1155  ;;  %v441_v28 = vadd.f32 %v1154_v25, %v437_v8  ;;  %1175 = vpow2.f32 %v435_v26 }
 0x195   :  { %v442_v29 = vadd.f32 %v1156_v27, %v438_v24  ;;  %v1158_v30 = vpop.eup %1157 }
 0x196   :  { %v1160_v31 = vpop.eup %1159  ;;  %v445_v33 = vadd.f32 %v1158_v30, %v441_v28 }
 0x197   :  { %v1162_v34 = vpop.eup %1161  ;;  %v446_v36 = vadd.f32 %v1160_v31, %v442_v29 }
 0x198   :  { %v1164_v37 = vpop.eup %1163  ;;  %1177 = vrcp.f32 %v445_v33 }
 0x199   :  { %v1166_v39 = vpop.eup %1165  ;;  %1179 = vrcp.f32 %v446_v36  ;;  %v1136_v36 = vld [vmem:[%s1628_s5 + $0x8] sm:$0xff]  }
 0x19a   :  { %v1168_v40 = vpop.eup %1167  ;;  %v439_v42 = vadd.f32 %v1166_v39, %v1162_v34 }
 0x19b   :  { %v1170_v43 = vpop.eup %1169 }
 0x19c   :  { %v1172_v44 = vpop.eup %1171  ;;  %v443_v45 = vadd.f32 %v1164_v37, %v439_v42  ;;  %v440_v46 = vadd.f32 %v1170_v43, %v1168_v40 }
 0x19d   :  { %v1174_v47 = vpop.eup %1173 }
 0x19e   :  { %v447_v48 = vadd.f32 %v1174_v47, %v443_v45  ;;  %v444_v49 = vadd.f32 %v1172_v44, %v440_v46  ;;  %v1176_v50 = vpop.eup %1175 }
 0x1a0   :  { %1181 = vrcp.f32 %v447_v48  ;;  %v448_v52 = vadd.f32 %v1176_v50, %v444_v49 }
 0x1a2   :  { %v1178_v55 = vpop.eup %1177  ;;  %1183 = vrcp.f32 %v448_v52 }
 0x1a3   :  { %v1180_v57 = vpop.eup %1179  ;;  %v453_v58 = vmul.f32 %v1178_v55, %v343_v54 }
 0x1a4   :  { %v454_v59 = vmul.f32 %v1180_v57, %v346_v56 }
 0x1a5   :  { %v461_v60 = vmul.f32 %v1150_v19, %v453_v58  ;;  %v457_v61 = vmul.f32 %v1146_v14, %v453_v58  ;;  %v477_v62 = vmul.f32 %v1158_v30, %v453_v58  ;;  %v469_v63 = vmul.f32 %v1154_v25, %v453_v58 }
 0x1a6   :  { %v458_v0 = vmul.f32 %v1148_v17, %v454_v59  ;;  %v462_v1 = vmul.f32 %v1152_v20, %v454_v59  ;;  %v470_v2 = vmul.f32 %v1156_v27, %v454_v59  ;;  %v478_v3 = vmul.f32 %v1160_v31, %v454_v59 }
 0x1a8   :  { %v465_v5 = vadd.f32 %v462_v1, %v457_v61 }
 0x1aa   :  { %v1182_v35 = vpop.eup %1181 }
 0x1ab   :  { %v455_v9 = vmul.f32 %v1182_v35, %v351_v6 }
 0x1ac   :  { %v1184_v10 = vpop.eup %1183 }
 0x1ad   :  { %v459_v12 = vmul.f32 %v1166_v39, %v455_v9  ;;  %v456_v16 = vmul.f32 %v1184_v10, %v354_v41  ;;  %v463_v11 = vmul.f32 %v1162_v34, %v455_v9  ;;  %v471_v14 = vmul.f32 %v1164_v37, %v455_v9  ;;  %v1137_v37 = vld [vmem:[%s1632_s9] sm:$0xff]   ;;  %v498_v39 = vpop.permute.xlu0 %497 }
 0x1ae   :  { %v479_v19 = vmul.f32 %v1174_v47, %v455_v9 }
 0x1af   :  { %v460_v21 = vmul.f32 %v1168_v40, %v456_v16  ;;  %v464_v17 = vmul.f32 %v1170_v43, %v456_v16  ;;  %v466_v20 = vadd.f32 %v463_v11, %v458_v0  ;;  %v472_v22 = vmul.f32 %v1172_v44, %v456_v16  ;;  %v503_v40 = vpop.permute.xlu1 %502 }
 0x1b0   :  { %v473_v8 = vadd.f32 %v471_v14, %v465_v5  ;;  %v480_v24 = vmul.f32 %v1176_v50, %v456_v16 }
 0x1b1   :  { %v474_v25 = vadd.f32 %v472_v22, %v466_v20  ;;  %v467_v26 = vadd.f32 %v464_v17, %v459_v12  ;;  %v468_v32 = vadd.f32 %v461_v60, %v460_v21  ;;  %v508_v46 = vpop.permute.xlu0 %507 }
 0x1b2   :  { %v481_v27 = vadd.f32 %v480_v24, %v473_v8 }
 0x1b3   :  { %v482_v28 = vadd.f32 %v477_v62, %v474_v25  ;;  %v475_v29 = vadd.f32 %v469_v63, %v467_v26  ;;  %v476_v30 = vadd.f32 %v470_v2, %v468_v32  ;;  %v513_v50 = vpop.permute.xlu1 %512 }
 0x1b5   :  { %v489_v38 = vpack.c.bf16 %v482_v28, %v481_v27  ;;  %v483_v31 = vadd.f32 %v478_v3, %v475_v29  ;;  %v484_v33 = vadd.f32 %v479_v19, %v476_v30  ;;  %v629_v19 = vpop.permute.xlu0 %628 }
 0x1b7   :  { %1091 = vmatprep.subr.bf16.mxu1 %v489_v38  ;;  %v490_v34 = vpack.c.bf16 %v484_v33, %v483_v31  ;;  %v634_v14 = vpop.permute.xlu1 %633 }
 0x1b8   :  { %1092 = vmatpush3.bf16.msra.mxu1 %v489_v38 }
 0x1b9   :  { %1093 = vmatprep.subr.bf16.mxu1 %v490_v34  ;;  %v653_v22 = vpop.permute.xlu0 %652 }
 0x1bb   :  { %v658_v20 = vpop.permute.xlu1 %657 }
 0x1bc   :  { %1094 = vmatpush3.bf16.msra.mxu1 %v490_v34 }
 0x1bd   :  { %v639_v24 = vpop.permute.xlu0 %638 }
 0x1bf   :  { %1096 = vmatmul.mubr.msk.bf16.vlgmr.msra.gmra.mrb[0].mxu1 %vm257_vm0, %v1136_v36  ;;  %v644_v8 = vpop.permute.xlu1 %643 }
 0x1c0   :  { %1103 = vmatprep.mubr.msk.bf16.mxu1 %vm257_vm0, %v1137_v37 }
 0x1c1   :  { %v663_v34 = vpop.permute.xlu0 %662 }
 0x1c3   :  { %v668_v33 = vpop.permute.xlu1 %667 }
 0x292   :  { %v1097_v42 = vpop.f32.mrb[0].mxu1 }
 0x293   :  { %v565_v43 = vpop.f32.mrb[1].mxu1  ;;  %v574_v48 = vadd.f32 %v1097_v42, %v508_v46  ;;  %v1140_v46 = vld [vmem:[%s1632_s9 + $0x18] sm:$0xff]  }
 0x294   :  { %v566_v44 = vadd.f32 %v565_v43, %v498_v39  ;;  %v1098_v45 = vpop.f32.mrb[2].mxu1 }
 0x295   :  { %v568_v47 = vpop.f32.mrb[3].mxu1  ;;  %v577_v52 = vadd.f32 %v1098_v45, %v513_v50  ;;  %v1532_v54 = vadd.f32 %v574_v48, %v1360_v18  ;;  %v1139_v45 = vld [vmem:[%s1632_s9 + $0x10] sm:$0xff]   ;;  %v695_v48 = vpop.permute.xlu0 %694 }
 0x296   :  { %v569_v49 = vadd.f32 %v568_v47, %v503_v40  ;;  %v1526_v51 = vadd.f32 %v566_v44, %v1340_v13  ;;  %v1138_v44 = vld [vmem:[%s1632_s9 + $0x8] sm:$0xff]   ;;  %v1141_v47 = vld [vmem:[%s1634_s11] sm:$0xff]  }
 0x297   :  { %v1537_v56 = vadd.f32 %v577_v52, %v1374_v23  ;;  %1119 = vmatprep.mubr.msk.bf16.mxu0 %vm943_vm1, %v1141_v47 }
 0x298   :  { %v1529_v53 = vadd.f32 %v569_v49, %v1348_v15  ;;  %v700_v49 = vpop.permute.xlu1 %699 }
 0x299   :  { %v705_v50 = vpop.permute.xlu0 %704 }
 0x29a   :  { %v592_v55 = vadd.f32 %v1529_v53, %v1526_v51 }
 0x29c   :  { %v593_v57 = vadd.f32 %v592_v55, %v1532_v54  ;;  %v710_v52 = vpop.permute.xlu1 %709 }
 0x29e   :  { %v594_v58 = vadd.f32 %v593_v57, %v1537_v56 }
 0x2a0   :  { %v595_v59 = vrot.slane %v594_v58, 4 }
 0x2a2   :  { %v596_v13 = vadd.f32 %v595_v59, %v594_v58  ;;  %v715_v59 = vpop.permute.xlu0 %714 }
 0x2a4   :  { %v597_v60 = vrot.slane %v596_v13, 2 }
 0x2a6   :  { %v598_v61 = vadd.f32 %v597_v60, %v596_v13 }
 0x2a8   :  { %v599_v62 = vrot.slane %v598_v61, 1 }
 0x2aa   :  { %v600_v15 = vadd.f32 %v599_v62, %v598_v61 }
 0x2ac   :  { %v601_v63 = vmul.f32 0.03125, %v600_v15 }
 0x2ae   :  { %v602_v18 = vsub.f32 %v1526_v51, %v601_v63  ;;  %v603_v0 = vsub.f32 %v1529_v53, %v601_v63  ;;  %v604_v1 = vsub.f32 %v1532_v54, %v601_v63  ;;  %v605_v23 = vsub.f32 %v1537_v56, %v601_v63  ;;  %v720_v63 = vpop.permute.xlu1 %719 }
 0x2b0   :  { %v606_v2 = vmul.f32 %v602_v18, %v602_v18  ;;  %v607_v3 = vmul.f32 %v603_v0, %v603_v0  ;;  %v608_v4 = vmul.f32 %v604_v1, %v604_v1  ;;  %v609_v6 = vmul.f32 %v605_v23, %v605_v23 }
 0x2b2   :  { %v610_v5 = vadd.f32 %v607_v3, %v606_v2 }
 0x2b4   :  { %v611_v35 = vadd.f32 %v610_v5, %v608_v4 }
 0x2b6   :  { %v612_v7 = vadd.f32 %v611_v35, %v609_v6  ;;  %v725_v6 = vpop.permute.xlu0 %724 }
 0x2b8   :  { %v613_v9 = vrot.slane %v612_v7, 4 }
 0x2ba   :  { %v614_v41 = vadd.f32 %v613_v9, %v612_v7 }
 0x2bc   :  { %v615_v10 = vrot.slane %v614_v41, 2 }
 0x2be   :  { %v616_v12 = vadd.f32 %v615_v10, %v614_v41 }
 0x2c0   :  { %v617_v16 = vrot.slane %v616_v12, 1 }
 0x2c2   :  { %v618_v11 = vadd.f32 %v617_v16, %v616_v12 }
 0x2c4   :  { %v619_v21 = vmul.f32 0.03125, %v618_v11  ;;  %v730_v11 = vpop.permute.xlu1 %729 }
 0x2c6   :  { %v620_v17 = vadd.f32 1e-06, %v619_v21 }
 0x2c8   :  { %1185 = vrsqrt.f32 %v620_v17 }
 0x2d2   :  { %v1186_v25 = vpop.eup %1185 }
 0x2d3   :  { %v623_v26 = vmul.f32 %v1186_v25, %v603_v0  ;;  %v622_v32 = vmul.f32 %v1186_v25, %v602_v18  ;;  %v624_v27 = vmul.f32 %v1186_v25, %v604_v1  ;;  %v625_v28 = vmul.f32 %v1186_v25, %v605_v23 }
 0x2d5   :  { %v646_v29 = vmul.f32 %v629_v19, %v622_v32  ;;  %v647_v30 = vmul.f32 %v634_v14, %v623_v26  ;;  %v648_v38 = vmul.f32 %v639_v24, %v624_v27  ;;  %v649_v31 = vmul.f32 %v644_v8, %v625_v28 }
 0x2d7   :  { %v670_v36 = vadd.f32 %v653_v22, %v646_v29  ;;  %v671_v37 = vadd.f32 %v658_v20, %v647_v30  ;;  %v672_v39 = vadd.f32 %v663_v34, %v648_v38  ;;  %v673_v40 = vadd.f32 %v668_v33, %v649_v31 }
 0x2d9   :  { %v682_v42 = vpack.c.bf16 %v671_v37, %v670_v36  ;;  %v683_v43 = vpack.c.bf16 %v673_v40, %v672_v39 }
 0x2db   :  { %1099 = vmatprep.subr.bf16.mxu1 %v682_v42 }
 0x2dc   :  { %1100 = vmatpush3.bf16.msra.mxu1 %v682_v42 }
 0x2dd   :  { %1101 = vmatprep.subr.bf16.mxu1 %v683_v43 }
 0x2e0   :  { %1102 = vmatpush3.bf16.msra.mxu1 %v683_v43 }
 0x2e3   :  { %1104 = vmatmul.mubr.msk.bf16.vlgmr.msra.gmra.mrb[4].mxu1 %vm257_vm0, %v1138_v44 }
 0x2e4   :  { %1107 = vmatprep.mubr.msk.bf16.mxu1 %vm257_vm0, %v1139_v45 }
 0x2eb   :  { %1108 = vmatmul.mubr.msk.bf16.gmra.mrb[8].mxu1 %vm257_vm0, %v1140_v46 }
 0x3b6   :  { %v1105_v55 = vpop.f32.mrb[4].mxu1 }
 0x3b7   :  { %v1561_v57 = vadd.f32 %v1105_v55, %v705_v50  ;;  %v798_v58 = vpop.f32.mrb[5].mxu1 }
 0x3b8   :  { %v1563_v13 = vadd.f32 %v798_v58, %v695_v48  ;;  %v1106_v60 = vpop.f32.mrb[6].mxu1 }
 0x3b9   :  { %v839_v61 = vmul.f32 0.044715, %v1561_v57  ;;  %v1566_v62 = vadd.f32 %v1106_v60, %v710_v52  ;;  %v801_v15 = vpop.f32.mrb[7].mxu1 }
 0x3ba   :  { %v837_v18 = vmul.f32 0.044715, %v1563_v13  ;;  %v1569_v0 = vadd.f32 %v801_v15, %v700_v49 }
 0x3bb   :  { %v847_v1 = vmul.f32 %v839_v61, %v1561_v57  ;;  %v840_v23 = vmul.f32 0.044715, %v1566_v62 }
 0x3bc   :  { %v845_v2 = vmul.f32 %v837_v18, %v1563_v13  ;;  %v838_v3 = vmul.f32 0.044715, %v1569_v0  ;;  %v832_v18 = vmul.f32 0.5, %v1566_v62 }
 0x3bd   :  { %v855_v4 = vmul.f32 %v847_v1, %v1561_v57  ;;  %v848_v5 = vmul.f32 %v840_v23, %v1566_v62  ;;  %v829_v23 = vmul.f32 0.5, %v1563_v13 }
 0x3be   :  { %v853_v35 = vmul.f32 %v845_v2, %v1563_v13  ;;  %v846_v7 = vmul.f32 %v838_v3, %v1569_v0  ;;  %v1109_v9 = vpop.f32.mrb[8].mxu1  ;;  %v830_v2 = vmul.f32 0.5, %v1569_v0 }
 0x3bf   :  { %v856_v41 = vmul.f32 %v848_v5, %v1566_v62  ;;  %v1580_v10 = vadd.f32 %v1109_v9, %v725_v6  ;;  %v814_v12 = vpop.f32.mrb[9].mxu1  ;;  %v863_v16 = vadd.f32 %v855_v4, %v1561_v57 }
 0x3c0   :  { %v854_v14 = vmul.f32 %v846_v7, %v1569_v0  ;;  %v1584_v19 = vadd.f32 %v814_v12, %v715_v59  ;;  %v1110_v21 = vpop.f32.mrb[10].mxu1  ;;  %v861_v17 = vadd.f32 %v853_v35, %v1563_v13 }
 0x3c1   :  { %v843_v20 = vmul.f32 0.044715, %v1580_v10  ;;  %v826_v22 = vadd.f32 %v1110_v21, %v730_v11  ;;  %v817_v8 = vpop.f32.mrb[11].mxu1  ;;  %v864_v24 = vadd.f32 %v856_v41, %v1566_v62  ;;  %v871_v25 = vmul.f32 0.7978846, %v863_v16 }
 0x3c2   :  { %v841_v26 = vmul.f32 0.044715, %v1584_v19  ;;  %v818_v32 = vadd.f32 %v817_v8, %v720_v63  ;;  %v862_v27 = vadd.f32 %v854_v14, %v1569_v0  ;;  %v869_v28 = vmul.f32 0.7978846, %v861_v17 }
 0x3c3   :  { %v851_v29 = vmul.f32 %v843_v20, %v1580_v10  ;;  %v844_v30 = vmul.f32 0.044715, %v826_v22  ;;  %v872_v38 = vmul.f32 0.7978846, %v864_v24  ;;  %1187 = vtanh.f32 %v871_v25 }
 0x3c4   :  { %v849_v31 = vmul.f32 %v841_v26, %v1584_v19  ;;  %v842_v33 = vmul.f32 0.044715, %v818_v32  ;;  %v870_v34 = vmul.f32 0.7978846, %v862_v27  ;;  %1189 = vtanh.f32 %v869_v28 }
 0x3c5   :  { %v859_v36 = vmul.f32 %v851_v29, %v1580_v10  ;;  %v852_v37 = vmul.f32 %v844_v30, %v826_v22  ;;  %1191 = vtanh.f32 %v872_v38  ;;  %v831_v63 = vmul.f32 0.5, %v1561_v57 }
 0x3c6   :  { %v857_v39 = vmul.f32 %v849_v31, %v1584_v19  ;;  %v850_v40 = vmul.f32 %v842_v33, %v818_v32  ;;  %1193 = vtanh.f32 %v870_v34  ;;  %v835_v62 = vmul.f32 0.5, %v1580_v10 }
 0x3c7   :  { %v860_v42 = vmul.f32 %v852_v37, %v826_v22  ;;  %v867_v43 = vadd.f32 %v859_v36, %v1580_v10  ;;  %v836_v13 = vmul.f32 0.5, %v826_v22  ;;  %v833_v0 = vmul.f32 0.5, %v1584_v19  ;;  %v1142_v10 = vld [vmem:[%s1634_s11 + $0x8] sm:$0xff]   ;;  %s1203_s11 = scalar_lea.vmem %s1013_s10, 512 }
 0x3c8   :  { %v858_v44 = vmul.f32 %v850_v40, %v818_v32  ;;  %v865_v45 = vadd.f32 %v857_v39, %v1584_v19  ;;  %v834_v17 = vmul.f32 0.5, %v818_v32  ;;  %v916_v19 = vpop.permute.xlu0 %915  ;;  %p1204_p0 = scmp.ne.s32.totalorder %s1013_s10, %s1203_s11  ;;  %p1209_p2 = scmp.lt.s32.totalorder %s1203_s11, %s1203_s11 }
 0x3c9   :  { %v868_v46 = vadd.f32 %v860_v42, %v826_v22  ;;  %v875_v47 = vmul.f32 0.7978846, %v867_v43  ;;  %v921_v22 = vpop.permute.xlu1 %920 }
 0x3ca   :  { %v866_v48 = vadd.f32 %v858_v44, %v818_v32  ;;  %v873_v49 = vmul.f32 0.7978846, %v865_v45  ;;  %p1210_p3 = por %p1209_p2, %p1208_p1 }
 0x3cb   :  { %v876_v50 = vmul.f32 0.7978846, %v868_v46  ;;  %1195 = vtanh.f32 %v875_v47 }
 0x3cc   :  { %v874_v52 = vmul.f32 0.7978846, %v866_v48  ;;  %1197 = vtanh.f32 %v873_v49  ;;  %v926_v32 = vpop.permute.xlu0 %925  ;;  %p1211_p4 = pnand %p1210_p3, %p1204_p0 }
 0x3cd   :  { %v1188_v55 = vpop.eup %1187  ;;  %1199 = vtanh.f32 %v876_v50  ;;  %v931_v31 = vpop.permute.xlu1 %930 }
 0x3ce   :  { %v1190_v58 = vpop.eup %1189  ;;  %v887_v59 = vadd.f32 1.0, %v1188_v55  ;;  %1201 = vtanh.f32 %v874_v52 }
 0x3cf   :  { %v1192_v60 = vpop.eup %1191  ;;  %v885_v61 = vadd.f32 1.0, %v1190_v58 }
 0x3d0   :  { %v1194_v15 = vpop.eup %1193  ;;  %v888_v1 = vadd.f32 1.0, %v1192_v60  ;;  %v895_v4 = vmul.f32 %v887_v59, %v831_v63 }
 0x3d1   :  { %v886_v3 = vadd.f32 1.0, %v1194_v15  ;;  %v893_v6 = vmul.f32 %v885_v61, %v829_v23 }
 0x3d2   :  { %v896_v5 = vmul.f32 %v888_v1, %v832_v18 }
 0x3d3   :  { %v894_v35 = vmul.f32 %v886_v3, %v830_v2 }
 0x3d4   :  { %v906_v7 = vpack.c.bf16 %v896_v5, %v895_v4 }
 0x3d5   :  { %v1196_v9 = vpop.eup %1195  ;;  %v905_v41 = vpack.c.bf16 %v894_v35, %v893_v6 }
 0x3d6   :  { %v1198_v12 = vpop.eup %1197  ;;  %v891_v16 = vadd.f32 1.0, %v1196_v9 }
 0x3d7   :  { %v1200_v11 = vpop.eup %1199  ;;  %1111 = vmatprep.subr.bf16.mxu0 %v905_v41  ;;  %v889_v57 = vadd.f32 1.0, %v1198_v12 }
 0x3d8   :  { %v1202_v14 = vpop.eup %1201  ;;  %1112 = vmatpush3.bf16.msra.mxu0 %v905_v41  ;;  %v892_v21 = vadd.f32 1.0, %v1200_v11  ;;  %v899_v8 = vmul.f32 %v891_v16, %v835_v62 }
 0x3d9   :  { %1113 = vmatprep.subr.bf16.mxu0 %v906_v7  ;;  %v890_v20 = vadd.f32 1.0, %v1202_v14  ;;  %v897_v25 = vmul.f32 %v889_v57, %v833_v0 }
 0x3da   :  { %v900_v24 = vmul.f32 %v892_v21, %v836_v13 }
 0x3db   :  { %v898_v26 = vmul.f32 %v890_v20, %v834_v17 }
 0x3dc   :  { %1114 = vmatpush3.bf16.msra.mxu0 %v906_v7  ;;  %v908_v27 = vpack.c.bf16 %v900_v24, %v899_v8 }
 0x3dd   :  { %v907_v28 = vpack.c.bf16 %v898_v26, %v897_v25 }
 0x3df   :  { %1115 = vmatprep.subr.bf16.mxu0 %v907_v28 }
 0x3e0   :  { %1116 = vmatpush3.bf16.msra.mxu0 %v907_v28 }
 0x3e1   :  { %1117 = vmatprep.subr.bf16.mxu0 %v908_v27 }
 0x3e4   :  { %1118 = vmatpush3.bf16.msra.mxu0 %v908_v27 }
 0x3e7   :  { %1120 = vmatmul.mubr.msk.bf16.vlgmr.msra.gmra.mrb[12].mxu0 %vm943_vm1, %v1142_v10 }
 0x4ba   :  { %v1121_v29 = vpop.f32.mrb[12].mxu0 }
 0x4bb   :  { %v993_v30 = vadd.f32 %v1121_v29, %v926_v32  ;;  %v984_v38 = vpop.f32.mrb[13].mxu0 }
 0x4bc   :  { %v985_v33 = vadd.f32 %v984_v38, %v916_v19  ;;  %v1122_v34 = vpop.f32.mrb[14].mxu0 }
 0x4bd   :  { %v1001_v36 = vadd.f32 %v993_v30, %v1532_v54  ;;  %v996_v37 = vadd.f32 %v1122_v34, %v931_v31  ;;  %v987_v39 = vpop.f32.mrb[15].mxu0 }
 0x4be   :  { %v999_v40 = vadd.f32 %v985_v33, %v1526_v51  ;;  %v988_v42 = vadd.f32 %v987_v39, %v921_v22 }
 0x4bf   :  { %1005 = vst [vmem:[#allocation2 + $0x10] sm:$0xff] %v1001_v36  ;;  %v1002_v43 = vadd.f32 %v996_v37, %v1537_v56 }
 0x4c0   :  { %1003 = vst [vmem:[#allocation2] sm:$0xff] %v999_v40  ;;  %v1000_v44 = vadd.f32 %v988_v42, %v1529_v53 }
 0x4c1   :  { %1006 = vst [vmem:[#allocation2 + $0x18] sm:$0xff] %v1002_v43 }
 0x4c2   :  { %1004 = vst [vmem:[#allocation2 + $0x8] sm:$0xff] %v1000_v44 }
 0x4c3   :  { %1214 = shalt.err (!%p1211_p4)
}
 0x4c4   :  { %s1215_s20 = scalar_lea.hbm %s1636_s13, 512 }
 0x4c5   :  { %p1216_p5 = scmp.ne.s32.totalorder %s1636_s13, %s1215_s20  ;;  %p1219_p6 = scmp.lt.u32.totalorder %s1215_s20, %s1636_s13 }
 0x4c7   :  { %p1221_p7 = pnand %p1219_p6, %p1216_p5 }
 0x4c9   :  { %1224 = shalt.err (!%p1221_p7)
}
 0x4ca   :  { %s1229_s24 = smov 128   ;;  %s1230_s25 = smov 8  }
 0x4cb   :  { %1018 = dma.vmem_to_hbm [thread:$0]  %s1013_s10, 512, %s1636_s13, [#allocation3], %s1229_s24, %s1229_s24, %s1230_s25  }
 0x4cc   :  { %1225 = dma.done.wait [#allocation3], 512  }
 0x4cd   :  { %1226 = vsyncadd [#allocation3], 4294966784 }
 0x4ce   :  { %1022 = vsyncpa [#allocation3], 1 }

</bundles_post_ra>
